<compile_context>
chip_gen: v7x
topology: tpu7x:2x2x1
jax: 0.10.0
libtpu: 0.0.40
codegen_flags: <defaults>
</compile_context>

<pallas_src>
import jax
import jax.numpy as jnp
from jax.experimental import pallas as pl
from jax.experimental.pallas import tpu as pltpu


def fm_kernel(w0_ref, x_ref, wcat_ref, w2sq_ref, o_ref):
    # w0_ref: (1,) in SMEM. x_ref: (TB, F). wcat_ref: (F, D+1) = [w2 | w1].
    # w2sq_ref: (F, D) = w2*w2 (precomputed). o_ref: (TB, 1).
    d = w2sq_ref.shape[1]

    x = x_ref[...]                                                       # (TB, F)

    # One MXU pass covers both the latent interaction and the linear term.
    xw = jnp.dot(x, wcat_ref[...], preferred_element_type=jnp.float32)   # (TB, D+1)
    xw2 = xw[:, :d]                                                      # x @ w2
    first = xw[:, d:]                                                    # x @ w1  (TB, 1)

    x2w2sq = jnp.dot(x * x, w2sq_ref[...],
                     preferred_element_type=jnp.float32)                 # (TB, D)
    second = 0.5 * jnp.sum(xw2 * xw2 - x2w2sq, axis=1, keepdims=True)    # (TB, 1)

    o_ref[...] = (w0_ref[0] + first + second).astype(o_ref.dtype)


def _round_up(n, m):
    return ((n + m - 1) // m) * m


def _choose_batch_tile(batch, fea_num):
    """Pick a batch tile so the double-buffered f32 x tile fits a conservative
    VMEM budget (safe on v7x's 64 MiB VMEM as well as v5e/v6e's 128 MiB)."""
    x_budget = 24 * 1024 * 1024                       # bytes for 2 x buffers
    max_tb = max(8, (x_budget // (2 * fea_num * 4)) // 8 * 8)
    tb = min(512, max_tb)
    if batch <= tb:
        tb = _round_up(batch, 8)
        return tb, tb
    return tb, _round_up(batch, tb)


@jax.jit
def fm_forward(x, w0, w1, w2):
    batch, fea_num = x.shape
    latent_dim = w2.shape[1]

    tb, batch_p = _choose_batch_tile(batch, fea_num)
    num_tiles = batch_p // tb

    # Batch-invariant weight prep, hoisted out of the per-tile kernel body.
    wcat = jnp.concatenate([w2, w1], axis=1).astype(jnp.float32)    # (F, D+1)
    w2sq = (w2 * w2).astype(jnp.float32)                            # (F, D)

    x_p = x.astype(jnp.float32)
    if batch_p != batch:
        x_p = jnp.pad(x_p, ((0, batch_p - batch), (0, 0)))

    # VMEM estimate: double-buffered x tile + (double-buffered) weights +
    # lane-padded output tile; add headroom and clamp to v7x-safe 64 MiB.
    vmem_need = (2 * tb * fea_num
                 + 2 * fea_num * (2 * latent_dim + 1)
                 + 2 * tb * 128) * 4
    vmem_limit = int(min(64 * 1024 * 1024,
                         max(16 * 1024 * 1024, int(1.5 * vmem_need))))

    out = pl.pallas_call(
        fm_kernel,
        out_shape=jax.ShapeDtypeStruct((batch_p, 1), jnp.float32),
        grid_spec=pltpu.PrefetchScalarGridSpec(
            num_scalar_prefetch=0,
            grid=(num_tiles,),
            in_specs=[
                pl.BlockSpec(memory_space=pltpu.MemorySpace.SMEM),          # w0 (1,)
                pl.BlockSpec((tb, fea_num), lambda i: (i, 0)),              # x tile
                pl.BlockSpec((fea_num, latent_dim + 1), lambda i: (0, 0)),  # [w2|w1]
                pl.BlockSpec((fea_num, latent_dim), lambda i: (0, 0)),      # w2^2
            ],
            out_specs=pl.BlockSpec((tb, 1), lambda i: (i, 0)),
        ),
        compiler_params=pltpu.CompilerParams(
            dimension_semantics=("parallel",),
            vmem_limit_bytes=vmem_limit,
        ),
    )(w0.astype(jnp.float32), x_p, wcat, w2sq)

    return out[:batch]


def fm_reference(x, w0, w1, w2):
    first = w0[0] + x @ w1
    second = 0.5 * jnp.sum((x @ w2) ** 2 - (x ** 2) @ (w2 ** 2),
                           axis=1, keepdims=True)
    return first + second


if __name__ == "__main__":
    key = jax.random.PRNGKey(0)

    # --- small case (module-scale shapes) --------------------------------
    batch, fea_num, latent_dim = 8, 32, 16
    kx, k1, k2, key = jax.random.split(key, 4)
    w0 = jnp.zeros((1,), dtype=jnp.float32)
    w1 = jax.random.uniform(k1, (fea_num, 1), dtype=jnp.float32)
    w2 = jax.random.uniform(k2, (fea_num, latent_dim), dtype=jnp.float32)
    x = jax.random.normal(kx, (batch, fea_num), dtype=jnp.float32)

    out = jax.block_until_ready(fm_forward(x, w0, w1, w2))
    ref = fm_reference(x, w0, w1, w2)
    assert out.shape == (batch, 1), out.shape
    assert jnp.allclose(out, ref, atol=1e-4, rtol=1e-4), (out, ref)

    # --- multi-tile case (exercises batch tiling + padding path) ---------
    batch2, fea_num2, latent_dim2 = 1100, 64, 8
    kx2, k12, k22, key = jax.random.split(key, 4)
    w0b = jnp.zeros((1,), dtype=jnp.float32)
    w1b = jax.random.uniform(k12, (fea_num2, 1), dtype=jnp.float32)
    w2b = jax.random.uniform(k22, (fea_num2, latent_dim2), dtype=jnp.float32)
    xb = jax.random.normal(kx2, (batch2, fea_num2), dtype=jnp.float32)

    out2 = jax.block_until_ready(fm_forward(xb, w0b, w1b, w2b))
    ref2 = fm_reference(xb, w0b, w1b, w2b)
    assert out2.shape == (batch2, 1), out2.shape
    assert jnp.allclose(out2, ref2, atol=1e-3, rtol=1e-3), (out2, ref2)

    print("KERNEL_OK")
</pallas_src>

<mosaic_0001>
module attributes {stable_mosaic.version = 11 : i64} {
  func.func @fm_kernel(%arg0: i32, %arg1: memref<1xf32, #tpu.memory_space<smem>>, %arg2: memref<8x32xf32, #tpu.memory_space<vmem>>, %arg3: memref<32x17xf32, #tpu.memory_space<vmem>>, %arg4: memref<32x16xf32, #tpu.memory_space<vmem>>, %arg5: memref<8x1xf32, #tpu.memory_space<vmem>>) attributes {dimension_semantics = [#tpu.dimension_semantics<parallel>], iteration_bounds = array<i64: 1>, scalar_prefetch = 0 : i64, scratch_operands = 0 : i64, tpu.core_type = #tpu.core_type<tc>, window_params = [{transform_indices = @transform_0, window_bounds = array<i64: 1>}, {transform_indices = @transform_1, window_bounds = array<i64: 8, 32>}, {pipeline_mode = #tpu.pipeline_mode<synchronous>, transform_indices = @transform_2, window_bounds = array<i64: 32, 17>}, {pipeline_mode = #tpu.pipeline_mode<synchronous>, transform_indices = @transform_3, window_bounds = array<i64: 32, 16>}, {transform_indices = @transform_4, window_bounds = array<i64: 8, 1>}]} {
    %c0 = arith.constant 0 : index
    %c0_0 = arith.constant 0 : index
    %0 = vector.load %arg2[%c0, %c0_0] : memref<8x32xf32, #tpu.memory_space<vmem>>, vector<8x32xf32>
    %c0_1 = arith.constant 0 : index
    %c0_2 = arith.constant 0 : index
    %1 = vector.load %arg3[%c0_1, %c0_2] : memref<32x17xf32, #tpu.memory_space<vmem>>, vector<32x17xf32>
    %cst = arith.constant dense<0.000000e+00> : vector<8x17xf32>
    %2 = tpu.matmul %0, %1, %cst {dimension_numbers = #tpu.dot_dimension_numbers<[1], [0], [0], [1], [0, 0, 1, 1], [], []>} : vector<8x32xf32>, vector<32x17xf32>, vector<8x17xf32> -> vector<8x17xf32>
    %3 = vector.extract_strided_slice %2 {offsets = [0, 0], sizes = [8, 16], strides = [1, 1]} : vector<8x17xf32> to vector<8x16xf32>
    %4 = vector.extract_strided_slice %2 {offsets = [0, 16], sizes = [8, 1], strides = [1, 1]} : vector<8x17xf32> to vector<8x1xf32>
    %5 = arith.mulf %0, %0 : vector<8x32xf32>
    %c0_3 = arith.constant 0 : index
    %c0_4 = arith.constant 0 : index
    %6 = vector.load %arg4[%c0_3, %c0_4] : memref<32x16xf32, #tpu.memory_space<vmem>>, vector<32x16xf32>
    %cst_5 = arith.constant dense<0.000000e+00> : vector<8x16xf32>
    %7 = tpu.matmul %5, %6, %cst_5 {dimension_numbers = #tpu.dot_dimension_numbers<[1], [0], [0], [1], [0, 0, 1, 1], [], []>} : vector<8x32xf32>, vector<32x16xf32>, vector<8x16xf32> -> vector<8x16xf32>
    %8 = arith.mulf %3, %3 : vector<8x16xf32>
    %9 = arith.subf %8, %7 : vector<8x16xf32>
    %cst_6 = arith.constant dense<0.000000e+00> : vector<8xf32>
    %10 = vector.multi_reduction <add>, %9, %cst_6 [1] : vector<8x16xf32> to vector<8xf32>
    %11 = vector.shape_cast %10 : vector<8xf32> to vector<8x1xf32>
    %cst_7 = arith.constant 5.000000e-01 : f32
    %12 = vector.broadcast %cst_7 : f32 to vector<8x1xf32>
    %13 = arith.mulf %12, %11 : vector<8x1xf32>
    %c0_8 = arith.constant 0 : index
    %14 = memref.load %arg1[%c0_8] : memref<1xf32, #tpu.memory_space<smem>>
    %15 = vector.broadcast %14 : f32 to vector<8x1xf32>
    %16 = arith.addf %15, %4 : vector<8x1xf32>
    %17 = arith.addf %16, %13 : vector<8x1xf32>
    %c0_9 = arith.constant 0 : index
    %c0_10 = arith.constant 0 : index
    %18 = vector.load %arg5[%c0_9, %c0_10] : memref<8x1xf32, #tpu.memory_space<vmem>>, vector<8x1xf32>
    tpu.vector_store %arg5[%c0_9, %c0_10], %17 {strides = array<i32>} : memref<8x1xf32, #tpu.memory_space<vmem>>, vector<8x1xf32>,
    return
  }
  func.func @transform_0(%arg0: i32) -> i32 {
    %c0_i32 = arith.constant 0 : i32
    %c0_i32_0 = arith.constant 0 : i32
    return %c0_i32 : i32
  }
  func.func @transform_1(%arg0: i32) -> (i32, i32) {
    %c0_i32 = arith.constant 0 : i32
    %c0_i32_0 = arith.constant 0 : i32
    return %arg0, %c0_i32 : i32, i32
  }
  func.func @transform_2(%arg0: i32) -> (i32, i32) {
    %c0_i32 = arith.constant 0 : i32
    %c0_i32_0 = arith.constant 0 : i32
    %c0_i32_1 = arith.constant 0 : i32
    return %c0_i32, %c0_i32_0 : i32, i32
  }
  func.func @transform_3(%arg0: i32) -> (i32, i32) {
    %c0_i32 = arith.constant 0 : i32
    %c0_i32_0 = arith.constant 0 : i32
    %c0_i32_1 = arith.constant 0 : i32
    return %c0_i32, %c0_i32_0 : i32, i32
  }
  func.func @transform_4(%arg0: i32) -> (i32, i32) {
    %c0_i32 = arith.constant 0 : i32
    %c0_i32_0 = arith.constant 0 : i32
    return %arg0, %c0_i32 : i32, i32
  }
}

</mosaic_0001>

<bundles_post_ra>
// kernel: mul.1
= control target key start
LH: loop header
LB: loop body
LE: loop exit
PB: predicated region body
PF: predicated region fallthrough
CT: control target
= control target key end

     0   :  { %s56_s0 = inlined_call_operand.vmem [shape: f32[32,16], index: 0, kind: input, shape index: {}, may-alias: {0,1}]   ;;  %s57_s1 = inlined_call_operand.vmem [shape: f32[32,16], index: 1, kind: input, shape index: {}, may-alias: {0,1}]   ;;  %s58_s2 = inlined_call_operand.vmem [shape: f32[32,16], index: 2, kind: output, shape index: {}]  }
   0x1   :  { %v3_v0 = vld [vmem:[%s56_s0] sm:$0xff]  ;;  %v20_v2 = vld [vmem:[%s56_s0 + $0x8] sm:$0xff] }
   0x2   :  { %v4_v1 = vld [vmem:[%s57_s1] sm:$0xff]  ;;  %v21_v4 = vld [vmem:[%s57_s1 + $0x8] sm:$0xff] }
   0x3   :  { %v7_v3 = vmul.f32 %v4_v1, %v3_v0  ;;  %v16_v5 = vmul.f32 %v21_v4, %v20_v2 }
   0x5   :  { %9 = vst [vmem:[%s58_s2] sm:$0xff] %v7_v3  ;;  %22 = vst [vmem:[%s58_s2 + $0x8] sm:$0xff] %v16_v5 }

// kernel: fm_forward.1
= control target key start
LH: loop header
LB: loop body
LE: loop exit
PB: predicated region body
PF: predicated region fallthrough
CT: control target
= control target key end

     0   :  { %v246_v0 = vmov 0.0|0.0   ;;  %vm247_vm0 = vmmov 0   ;;  %v248_v8 = vmov 0.0   ;;  %vm23_vm1 = vcmask 261120   ;;  %s308_s2 = inlined_call_operand.vmem [shape: f32[32,17], index: 2, kind: input, shape index: {}]   ;;  %s309_s3 = inlined_call_operand.vmem [shape: f32[32,16], index: 3, kind: input, shape index: {}]   ;;  %s310_s1 = inlined_call_operand.vmem [shape: f32[8,32], index: 1, kind: input, shape index: {}]   ;;  %s311_s0 = inlined_call_operand.<no memory space> [shape: f32[1], index: 0, kind: input, shape index: {}]   ;;  %s312_s4 = inlined_call_operand.vmem [shape: f32[8,1], index: 4, kind: output, shape index: {}]  }
   0x1   :  { %230 = vmatprep.subr.bf16.mxu0 %v246_v0  ;;  %v19_v1 = vld [vmem:[%s308_s2] sm:$0xff]  ;;  %v20_v2 = vld [vmem:[%s308_s2 + $0x8] sm:$0xff]  ;;  %236 = vmatprep.subr.bf16.mxu1 %v246_v0  ;;  %v21_v6 = vld [vmem:[%s308_s2 + $0x10] sm:$0xff]  ;;  %vm177_vm2 = vcmask 130048   ;;  %v183_v23 = vstv %s311_s0  ;;  %vm190_vm3 = vcmask 7168  }
   0x2   :  { %v98_v3 = vld [vmem:[%s309_s3] sm:$0xff]  ;;  %v231_v4 = vpack.c.bf16 %v20_v2, %v19_v1  ;;  %v99_v5 = vld [vmem:[%s309_s3 + $0x8] sm:$0xff]  ;;  %v22_v7 = vld [vmem:[%s308_s2 + $0x18] sm:$0xff]  ;;  %216 = vmatprep.mubr.msk.f32.mxu0 %vm247_vm0, %v248_v8  ;;  %227 = vmatprep.mubr.msk.f32.mxu1 %vm247_vm0, %v248_v8 }
   0x3   :  { %v237_v9 = vpack.c.bf16 %v99_v5, %v98_v3  ;;  %v100_v10 = vld [vmem:[%s309_s3 + $0x10] sm:$0xff]  ;;  %v101_v11 = vld [vmem:[%s309_s3 + $0x18] sm:$0xff]  ;;  %v234_v12 = vpack.c.bf16 %v22_v7, %v21_v6  ;;  %v18_v14 = vld [vmem:[%s310_s1] sm:$0xff]  ;;  %s249_s1 = smov 112  }
   0x4   :  { %232 = vmatpush3.bf16.msra.mxu0 %v231_v4  ;;  %v240_v13 = vpack.c.bf16 %v101_v11, %v100_v10  ;;  %v97_v15 = vmul.f32 %v18_v14, %v18_v14 }
   0x5   :  { %238 = vmatpush3.bf16.msra.mxu1 %v237_v9  ;;  %233 = vmatprep.subr.bf16.mxu0 %v246_v0 }
   0x6   :  { %239 = vmatprep.subr.bf16.mxu1 %v246_v0 }
   0x8   :  { %235 = vmatpush3.bf16.msra.mxu0 %v234_v12 }
   0x9   :  { %241 = vmatpush3.bf16.msra.mxu1 %v240_v13 }
   0xb   :  { %217 = vmatmul.mubr.msk.f32.vlgmr.msra.gmra.mrb[0].mxu0 %vm23_vm1, %v18_v14 }
   0xc   :  { %228 = vmatmul.mubr.msk.f32.vlgmr.msra.gmra.mrb[0].mxu1 %vm23_vm1, %v97_v15 }
  0xde   :  { %v93_v16 = vpop.f32.mrb[0].mxu0 }
  0xdf   :  { %v175_v17 = vmul.f32 %v93_v16, %v93_v16  ;;  %v218_v18 = vpop.f32.mrb[1].mxu0  ;;  %v171_v19 = vpop.f32.mrb[0].mxu1  ;;  %v184_v25 = vadd.f32 %v183_v23, %v93_v16 }
  0xe0   :  { %v229_v20 = vpop.f32.mrb[1].mxu1 }
  0xe1   :  { %v176_v21 = vsub.f32 %v175_v17, %v171_v19 }
  0xe3   :  { %v178_v22 = vsel %vm177_vm2, %v176_v21, 0.0 }
  0xe4   :  { %179 = vadd.xlane.f32.xlu0 %v178_v22 }
 0x171   :  { %v180_v24 = vpop.xlane.xlu0 %179 }
 0x172   :  { %v181_v26 = vmul.f32 0.5, %v180_v24 }
 0x174   :  { %v185_v27 = vadd.f32 %v184_v25, %v181_v26 }
 0x176   :  { %187 = vrot.lane.b32.xlu0 %v185_v27, %s249_s1 }
 0x1e8   :  { %v188_v28 = vpop.permute.xlu0 %187 }
 0x1e9   :  { %191 = vst.msk [vmem:[%s312_s4] sm:$0xff] %vm190_vm3, %v188_v28 }

</bundles_post_ra>
